<compile_context>
chip_gen: v7x
topology: tpu7x:2x2x1
jax: 0.10.0
libtpu: 0.0.40
codegen_flags: <defaults>
</compile_context>

<pallas_src>
import jax
import jax.numpy as jnp
from jax.experimental import pallas as pl
from jax.experimental.pallas import tpu as pltpu


# NF4 bucket thresholds (ascending) and the level assigned to values >= each
# threshold.  Values below the lowest threshold map to -1.0.  These are the
# exact constants from the PyTorch module's round_nf4 chain; the chain buckets
# on the *original* value, so a monotone cascade is exactly equivalent.
_NF4_THRESHOLDS = (
    -0.8480964004993439,
    -0.6106329262256622,
    -0.4599952697753906,
    -0.33967943489551544,
    -0.23460740596055984,
    -0.13791173323988914,
    -0.045525018125772476,
    0.03979014977812767,
    0.1202552504837513,
    0.2035212516784668,
    0.2920137718319893,
    0.3893125355243683,
    0.5016634166240692,
    0.6427869200706482,
    0.8614784181118011,
)
_NF4_LEVELS_ABOVE = (
    -0.6961928009986877,
    -0.5250730514526367,
    -0.39491748809814453,
    -0.28444138169288635,
    -0.18477343022823334,
    -0.09105003625154495,
    0.0,
    0.07958029955625534,
    0.16093020141124725,
    0.24611230194568634,
    0.33791524171829224,
    0.44070982933044434,
    0.5626170039176941,
    0.7229568362236023,
    1.0,
)


def _round_nf4_fast(q):
    """Monotone single-compare cascade, equivalent to the reference chain.

    Fallback value is q itself, so NaN rows (scale == 0 -> 0/0) pass through
    untouched exactly like the PyTorch compound-where chain.
    16 compares + 16 selects per element (vs ~64 VPU ops in the original).
    """
    out = jnp.where(q < _NF4_THRESHOLDS[0], -1.0, q)
    for t, lvl in zip(_NF4_THRESHOLDS, _NF4_LEVELS_ABOVE):
        out = jnp.where(q >= t, lvl, out)
    return out


def _nf4_quant_kernel(x_ref, o_ref):
    x = x_ref[...].astype(jnp.float32)                  # (rows_per_block, group)
    max_val = jnp.max(x, axis=1, keepdims=True)         # XLU reduce
    min_val = jnp.min(x, axis=1, keepdims=True)
    scale = jnp.maximum(jnp.abs(max_val), jnp.abs(min_val))
    # Divide -> EUP reciprocal + VPU multiply.  scale == 0 gives inf, and
    # 0 * inf = NaN, matching the 0/0 NaN of the reference module.
    inv_scale = pl.reciprocal(scale, approx=False)
    q = x * inv_scale
    q = _round_nf4_fast(q)
    o_ref[...] = (q * scale).astype(o_ref.dtype)


def _round_up(v, m):
    return ((v + m - 1) // m) * m


def ste_nf4_quantize(x, q_group_size=128, target_rows_per_block=2048,
                     min_grid_steps=8):
    """Forward pass of SteNF4Quantizer (value semantics; STE affects grads only)."""
    org_shape = x.shape
    if q_group_size > 0:
        assert org_shape[-1] % q_group_size == 0
        group = q_group_size
    elif q_group_size == -1:
        group = org_shape[-1]
    else:
        raise ValueError("q_group_size must be > 0 or == -1")

    qx = x.reshape(-1, group)
    n_rows = qx.shape[0]
    itemsize = jnp.dtype(qx.dtype).itemsize
    # Sublane granularity by element width (f32: 8, bf16: 16, int8/fp8: 32).
    sub = {4: 8, 2: 16, 1: 32}.get(itemsize, 8)

    # Big row tiles amortise the ~0.35us/step pipeline overhead; cap so that
    # (a) the grid keeps >= min_grid_steps steps ("parallel" axis can shard
    #     across both v7x TensorCores), and
    # (b) in+out double-buffered VMEM stays ~4 MiB at the default tile,
    #     safely under v5e's 16 MiB scoped default and v7x's 64 MiB VMEM.
    rpb = min(_round_up(target_rows_per_block, sub),
              _round_up(pl.cdiv(n_rows, min_grid_steps), sub))
    rpb = max(rpb, sub)
    grid = (pl.cdiv(n_rows, rpb),)   # partial last block masked by Pallas

    n_elems = n_rows * group
    cost = pl.CostEstimate(
        flops=40 * n_elems,               # compares/selects/muls + reductions
        transcendentals=n_rows,           # one reciprocal per group
        bytes_accessed=2 * n_elems * itemsize,
    )

    # Note: for q_group_size < 128 the lane dim is sub-128 (block last dim
    # equals the full array dim, so it still lowers); packing several groups
    # per 128-lane row would be a further perf win for that case.
    out = pl.pallas_call(
        _nf4_quant_kernel,
        out_shape=jax.ShapeDtypeStruct((n_rows, group), qx.dtype),
        grid_spec=pltpu.PrefetchScalarGridSpec(
            num_scalar_prefetch=0,
            grid=grid,
            in_specs=[pl.BlockSpec((rpb, group), lambda i: (i, 0))],
            out_specs=pl.BlockSpec((rpb, group), lambda i: (i, 0)),
        ),
        compiler_params=pltpu.CompilerParams(
            dimension_semantics=("parallel",)),
        cost_estimate=cost,
    )(qx)

    return out.reshape(org_shape)


# --------------------------- pure-JAX reference ---------------------------- #

def _round_nf4_reference(q):
    # Exact sequential compound-where chain of the PyTorch module.
    q = jnp.where(q >= 0.8614784181118011, 1.0, q)
    q = jnp.where((q < 0.8614784181118011) & (q >= 0.6427869200706482),
                  0.7229568362236023, q)
    q = jnp.where((q < 0.6427869200706482) & (q >= 0.5016634166240692),
                  0.5626170039176941, q)
    q = jnp.where((q < 0.5016634166240692) & (q >= 0.3893125355243683),
                  0.44070982933044434, q)
    q = jnp.where((q < 0.3893125355243683) & (q >= 0.2920137718319893),
                  0.33791524171829224, q)
    q = jnp.where((q < 0.2920137718319893) & (q >= 0.2035212516784668),
                  0.24611230194568634, q)
    q = jnp.where((q < 0.2035212516784668) & (q >= 0.1202552504837513),
                  0.16093020141124725, q)
    q = jnp.where((q < 0.1202552504837513) & (q >= 0.03979014977812767),
                  0.07958029955625534, q)
    q = jnp.where((q < 0.03979014977812767) & (q >= -0.045525018125772476),
                  0.0, q)
    q = jnp.where((q < -0.045525018125772476) & (q >= -0.13791173323988914),
                  -0.09105003625154495, q)
    q = jnp.where((q < -0.13791173323988914) & (q >= -0.23460740596055984),
                  -0.18477343022823334, q)
    q = jnp.where((q < -0.23460740596055984) & (q >= -0.33967943489551544),
                  -0.28444138169288635, q)
    q = jnp.where((q < -0.33967943489551544) & (q >= -0.4599952697753906),
                  -0.39491748809814453, q)
    q = jnp.where((q < -0.4599952697753906) & (q >= -0.6106329262256622),
                  -0.5250730514526367, q)
    q = jnp.where((q < -0.6106329262256622) & (q >= -0.8480964004993439),
                  -0.6961928009986877, q)
    q = jnp.where(q < -0.8480964004993439, -1.0, q)
    return q


def _reference(x, q_group_size=128):
    org_shape = x.shape
    group = q_group_size if q_group_size > 0 else org_shape[-1]
    qx = x.reshape(-1, group).astype(jnp.float32)
    max_val = jnp.max(qx, axis=1, keepdims=True)
    min_val = jnp.min(qx, axis=1, keepdims=True)
    scale = jnp.maximum(jnp.abs(max_val), jnp.abs(min_val))
    q = _round_nf4_reference(qx / scale) * scale
    return q.reshape(org_shape).astype(x.dtype)


if __name__ == "__main__":
    key = jax.random.PRNGKey(0)
    k1, k2 = jax.random.split(key)

    # Small shapes consistent with the module (last dim divisible by group).
    x = jax.random.normal(k1, (2, 4, 256), dtype=jnp.float32)
    y = jax.block_until_ready(ste_nf4_quantize(x, q_group_size=128))
    y_ref = _reference(x, q_group_size=128)
    assert y.shape == x.shape
    assert jnp.allclose(y, y_ref, atol=1e-5, rtol=1e-5)

    # Row count not a multiple of the tile -> exercises the cdiv/partial-block path.
    x2 = jax.random.normal(k2, (3, 5, 128), dtype=jnp.float32)
    y2 = jax.block_until_ready(ste_nf4_quantize(x2, q_group_size=128))
    y2_ref = _reference(x2, q_group_size=128)
    assert y2.shape == x2.shape
    assert jnp.allclose(y2, y2_ref, atol=1e-5, rtol=1e-5)

    print("KERNEL_OK")
</pallas_src>

<mosaic_0001>
module attributes {stable_mosaic.version = 11 : i64} {
  func.func @_nf4_quant_kernel(%arg0: i32, %arg1: memref<8x128xf32, #tpu.memory_space<vmem>>, %arg2: memref<8x128xf32, #tpu.memory_space<vmem>>) attributes {dimension_semantics = [#tpu.dimension_semantics<parallel>], iteration_bounds = array<i64: 2>, scalar_prefetch = 0 : i64, scratch_operands = 0 : i64, tpu.core_type = #tpu.core_type<tc>, window_params = [{transform_indices = @transform_0, window_bounds = array<i64: 8, 128>}, {transform_indices = @transform_1, window_bounds = array<i64: 8, 128>}]} {
    %c0 = arith.constant 0 : index
    %c0_0 = arith.constant 0 : index
    %0 = vector.load %arg1[%c0, %c0_0] : memref<8x128xf32, #tpu.memory_space<vmem>>, vector<8x128xf32>
    %cst = arith.constant dense<0xFF800000> : vector<8xf32>
    %1 = vector.multi_reduction <maximumf>, %0, %cst [1] : vector<8x128xf32> to vector<8xf32>
    %2 = vector.shape_cast %1 : vector<8xf32> to vector<8x1xf32>
    %cst_1 = arith.constant dense<0x7F800000> : vector<8xf32>
    %3 = vector.multi_reduction <minimumf>, %0, %cst_1 [1] : vector<8x128xf32> to vector<8xf32>
    %4 = vector.shape_cast %3 : vector<8xf32> to vector<8x1xf32>
    %5 = math.absf %2 : vector<8x1xf32>
    %6 = math.absf %4 : vector<8x1xf32>
    %7 = arith.maximumf %5, %6 : vector<8x1xf32>
    %8 = tpu.reciprocal %7 : vector<8x1xf32> -> vector<8x1xf32>
    %9 = vector.broadcast %8 : vector<8x1xf32> to vector<8x128xf32>
    %10 = arith.mulf %0, %9 : vector<8x128xf32>
    %cst_2 = arith.constant -0.84809637 : f32
    %11 = vector.broadcast %cst_2 : f32 to vector<8x128xf32>
    %12 = arith.cmpf olt, %10, %11 : vector<8x128xf32>
    %cst_3 = arith.constant -1.000000e+00 : f32
    %13 = vector.broadcast %cst_3 : f32 to vector<8x128xf32>
    %14 = arith.select %12, %13, %10 : vector<8x128xi1>, vector<8x128xf32>
    %cst_4 = arith.constant -0.84809637 : f32
    %15 = vector.broadcast %cst_4 : f32 to vector<8x128xf32>
    %16 = arith.cmpf oge, %10, %15 : vector<8x128xf32>
    %cst_5 = arith.constant -0.6961928 : f32
    %17 = vector.broadcast %cst_5 : f32 to vector<8x128xf32>
    %18 = arith.select %16, %17, %14 : vector<8x128xi1>, vector<8x128xf32>
    %cst_6 = arith.constant -0.610632896 : f32
    %19 = vector.broadcast %cst_6 : f32 to vector<8x128xf32>
    %20 = arith.cmpf oge, %10, %19 : vector<8x128xf32>
    %cst_7 = arith.constant -0.525073051 : f32
    %21 = vector.broadcast %cst_7 : f32 to vector<8x128xf32>
    %22 = arith.select %20, %21, %18 : vector<8x128xi1>, vector<8x128xf32>
    %cst_8 = arith.constant -0.45999527 : f32
    %23 = vector.broadcast %cst_8 : f32 to vector<8x128xf32>
    %24 = arith.cmpf oge, %10, %23 : vector<8x128xf32>
    %cst_9 = arith.constant -0.394917488 : f32
    %25 = vector.broadcast %cst_9 : f32 to vector<8x128xf32>
    %26 = arith.select %24, %25, %22 : vector<8x128xi1>, vector<8x128xf32>
    %cst_10 = arith.constant -0.33967942 : f32
    %27 = vector.broadcast %cst_10 : f32 to vector<8x128xf32>
    %28 = arith.cmpf oge, %10, %27 : vector<8x128xf32>
    %cst_11 = arith.constant -0.284441382 : f32
    %29 = vector.broadcast %cst_11 : f32 to vector<8x128xf32>
    %30 = arith.select %28, %29, %26 : vector<8x128xi1>, vector<8x128xf32>
    %cst_12 = arith.constant -0.234607399 : f32
    %31 = vector.broadcast %cst_12 : f32 to vector<8x128xf32>
    %32 = arith.cmpf oge, %10, %31 : vector<8x128xf32>
    %cst_13 = arith.constant -0.18477343 : f32
    %33 = vector.broadcast %cst_13 : f32 to vector<8x128xf32>
    %34 = arith.select %32, %33, %30 : vector<8x128xi1>, vector<8x128xf32>
    %cst_14 = arith.constant -0.137911737 : f32
    %35 = vector.broadcast %cst_14 : f32 to vector<8x128xf32>
    %36 = arith.cmpf oge, %10, %35 : vector<8x128xf32>
    %cst_15 = arith.constant -0.0910500362 : f32
    %37 = vector.broadcast %cst_15 : f32 to vector<8x128xf32>
    %38 = arith.select %36, %37, %34 : vector<8x128xi1>, vector<8x128xf32>
    %cst_16 = arith.constant -0.0455250181 : f32
    %39 = vector.broadcast %cst_16 : f32 to vector<8x128xf32>
    %40 = arith.cmpf oge, %10, %39 : vector<8x128xf32>
    %cst_17 = arith.constant 0.000000e+00 : f32
    %41 = vector.broadcast %cst_17 : f32 to vector<8x128xf32>
    %42 = arith.select %40, %41, %38 : vector<8x128xi1>, vector<8x128xf32>
    %cst_18 = arith.constant 0.0397901498 : f32
    %43 = vector.broadcast %cst_18 : f32 to vector<8x128xf32>
    %44 = arith.cmpf oge, %10, %43 : vector<8x128xf32>
    %cst_19 = arith.constant 0.0795802995 : f32
    %45 = vector.broadcast %cst_19 : f32 to vector<8x128xf32>
    %46 = arith.select %44, %45, %42 : vector<8x128xi1>, vector<8x128xf32>
    %cst_20 = arith.constant 0.120255247 : f32
    %47 = vector.broadcast %cst_20 : f32 to vector<8x128xf32>
    %48 = arith.cmpf oge, %10, %47 : vector<8x128xf32>
    %cst_21 = arith.constant 0.160930201 : f32
    %49 = vector.broadcast %cst_21 : f32 to vector<8x128xf32>
    %50 = arith.select %48, %49, %46 : vector<8x128xi1>, vector<8x128xf32>
    %cst_22 = arith.constant 0.203521252 : f32
    %51 = vector.broadcast %cst_22 : f32 to vector<8x128xf32>
    %52 = arith.cmpf oge, %10, %51 : vector<8x128xf32>
    %cst_23 = arith.constant 0.246112302 : f32
    %53 = vector.broadcast %cst_23 : f32 to vector<8x128xf32>
    %54 = arith.select %52, %53, %50 : vector<8x128xi1>, vector<8x128xf32>
    %cst_24 = arith.constant 0.292013764 : f32
    %55 = vector.broadcast %cst_24 : f32 to vector<8x128xf32>
    %56 = arith.cmpf oge, %10, %55 : vector<8x128xf32>
    %cst_25 = arith.constant 0.337915242 : f32
    %57 = vector.broadcast %cst_25 : f32 to vector<8x128xf32>
    %58 = arith.select %56, %57, %54 : vector<8x128xi1>, vector<8x128xf32>
    %cst_26 = arith.constant 0.389312536 : f32
    %59 = vector.broadcast %cst_26 : f32 to vector<8x128xf32>
    %60 = arith.cmpf oge, %10, %59 : vector<8x128xf32>
    %cst_27 = arith.constant 0.440709829 : f32
    %61 = vector.broadcast %cst_27 : f32 to vector<8x128xf32>
    %62 = arith.select %60, %61, %58 : vector<8x128xi1>, vector<8x128xf32>
    %cst_28 = arith.constant 0.501663446 : f32
    %63 = vector.broadcast %cst_28 : f32 to vector<8x128xf32>
    %64 = arith.cmpf oge, %10, %63 : vector<8x128xf32>
    %cst_29 = arith.constant 5.626170e-01 : f32
    %65 = vector.broadcast %cst_29 : f32 to vector<8x128xf32>
    %66 = arith.select %64, %65, %62 : vector<8x128xi1>, vector<8x128xf32>
    %cst_30 = arith.constant 0.64278692 : f32
    %67 = vector.broadcast %cst_30 : f32 to vector<8x128xf32>
    %68 = arith.cmpf oge, %10, %67 : vector<8x128xf32>
    %cst_31 = arith.constant 0.722956836 : f32
    %69 = vector.broadcast %cst_31 : f32 to vector<8x128xf32>
    %70 = arith.select %68, %69, %66 : vector<8x128xi1>, vector<8x128xf32>
    %cst_32 = arith.constant 0.861478447 : f32
    %71 = vector.broadcast %cst_32 : f32 to vector<8x128xf32>
    %72 = arith.cmpf oge, %10, %71 : vector<8x128xf32>
    %cst_33 = arith.constant 1.000000e+00 : f32
    %73 = vector.broadcast %cst_33 : f32 to vector<8x128xf32>
    %74 = arith.select %72, %73, %70 : vector<8x128xi1>, vector<8x128xf32>
    %75 = vector.broadcast %7 : vector<8x1xf32> to vector<8x128xf32>
    %76 = arith.mulf %74, %75 : vector<8x128xf32>
    %c0_34 = arith.constant 0 : index
    %c0_35 = arith.constant 0 : index
    %77 = vector.load %arg2[%c0_34, %c0_35] : memref<8x128xf32, #tpu.memory_space<vmem>>, vector<8x128xf32>
    tpu.vector_store %arg2[%c0_34, %c0_35], %76 {strides = array<i32>} : memref<8x128xf32, #tpu.memory_space<vmem>>, vector<8x128xf32>,
    return
  }
  func.func @transform_0(%arg0: i32) -> (i32, i32) {
    %c0_i32 = arith.constant 0 : i32
    %c0_i32_0 = arith.constant 0 : i32
    return %arg0, %c0_i32 : i32, i32
  }
  func.func @transform_1(%arg0: i32) -> (i32, i32) {
    %c0_i32 = arith.constant 0 : i32
    %c0_i32_0 = arith.constant 0 : i32
    return %arg0, %c0_i32 : i32, i32
  }
}

</mosaic_0001>

<bundles_post_ra>
// kernel: tpu_custom_call.1
= control target key start
LH: loop header
LB: loop body
LE: loop exit
PB: predicated region body
PF: predicated region fallthrough
CT: control target
= control target key end

     0   :  { %6 = vsyncpa [#allocation3], 0  ;;  %s595_s0 = inlined_call_operand.hbm [shape: f32[16,128], index: 0, kind: input, shape index: {}]   ;;  %s596_s1 = inlined_call_operand.hbm [shape: f32[16,128], index: 1, kind: output, shape index: {}]  }
   0x1   :  { %8 = vsyncpa [#allocation3 + $0x1], 0 }
   0x2   :  { %9 = vsyncpa [#allocation4], 0 }
   0x3   :  { %11 = vsyncpa [#allocation4 + $0x1], 0  ;;  %s430_s6 = smov 0   ;;  %s432_s7 = smov 0  }
   0x4   :  { %s434_s8 = smov 0   ;;  %s436_s9 = smov 0  }
   0x5 LB: > { %s451_s10 = sadd.s32 4294967295, %s416_s9   ;;  %s260_s11 = sadd.s32 4294967294, %s416_s9   ;;  %s416_s9 = sphi %s436_s9, %s611_s9   ;;  %s412_s8 = sphi %s434_s8, %s610_s8   ;;  %s408_s7 = sphi %s432_s7, %s609_s7   ;;  %s404_s6 = sphi %s430_s6, %s608_s6  }
   0x6   : > { %s455_s12 = sadd.s32 1, %s416_s9   ;;  %s24_s13 = sadd.s32 1, %s412_s8 }
   0x7   : > { %s21_s14 = ssub.s32 %s416_s9, %s455_s12  ;;  %p31_p0 = scmp.ne.s32.totalorder %s412_s8, %s408_s7 }
   0x8   : > { %p22_p1 = scmp.eq.s32.totalorder %s21_s14, 0  ;;  %p32_p2 = scmp.eq.s32.totalorder %s416_s9, 0 }
   0x9   : > { %p37_p3 = scmp.ne.s32.totalorder %s408_s7, %s404_s6  ;;  %p38_p4 = scmp.eq.s32.totalorder %s451_s10, 0 }
   0xa   : > { %s467_s15 = scalar_select %p22_p1, %s412_s8, %s24_s13  }
   0xb   : > { %p469_p5 = por %p32_p2, %p31_p0  ;;  %p473_p6 = por %p38_p4, %p37_p3 }
   0xc   : > { %p61_p7 = scmp.eq.s32.totalorder %s451_s10, 1  ;;  %p67_p8 = scmp.eq.s32.totalorder %s260_s11, 1 }
   0xd   : > { %p284_p10 = scmp.lt.s32.totalorder %s416_s9, 2  ;;  %s87_s20 = sand.u32 1, %s412_s8  }
   0xe   : > { %p480_p11 = por %p61_p7, %p31_p0  ;;  %p484_p12 = por %p67_p8, %p37_p3 }
   0xf   : > { %s264_s21 = sshll.u32 %s416_s9, 7  ;;  %s263_s22 = sshll.u32 %s87_s20, 3 }
  0x10   : > { %s600_s18 = scalar_select %p480_p11, 1, 0 }
  0x11   : > { %s601_s19 = scalar_select %p484_p12, 1, 0 }
  0x12   : > { %s493_s25 = scalar_lea.hbm %s595_s0, %s264_s21  ;;  %s91_s26 = scalar_lea.vmem [#allocation2], %s263_s22 }
  0x13   : > { %s98_s27 = sshll.u32 %s91_s26, 4  ;;  %p497_p13 = pnand %p284_p10, %p469_p5  ;;  %s501_s27 = int_to_ptr.vmem [resolvable:$true] %s98_s27 }
  0x14   : > { %s88_s29 = scalar_lea.sflag [#allocation3], %s87_s20  ;;  %s320_s30 = scalar_lea.hbm %s493_s25, 128 }
  0x15   : > { %p321_p2 = scmp.ne.s32.totalorder %s493_s25, %s320_s30  ;;  %p322_p3 = pneg %p497_p13 }
  0x16   : > { %s325_s4 = scalar_lea.hbm %s595_s0, 256  ;;  %p326_p5 = scmp.lt.u32.totalorder %s493_s25, %s595_s0 }
  0x17   : > { %p323_p4 = pnand %p322_p3, %p321_p2  ;;  %p327_p8 = scmp.lt.u32.totalorder %s325_s4, %s320_s30 }
  0x18   : > { %p329_p9 = scmp.lt.u32.totalorder %s320_s30, %s493_s25 }
  0x19   : > { %p324_p7 = pneg %p323_p4  ;;  %p328_p10 = por %p327_p8, %p326_p5 }
  0x1b   : > { %p330_p0 = por %p329_p9, %p328_p10 }
  0x1d   : > { %p331_p1 = pnand %p330_p0, %p324_p7 }
  0x1f   : > { %334 = shalt.err (!%p331_p1)
}
  0x20   : > { %s335_s13 = scalar_lea.vmem %s501_s27, 128  ;;  %s418_s14 = smov [#allocation2]  }
  0x21   : > { %p336_p2 = scmp.ne.s32.totalorder %s501_s27, %s335_s13  ;;  %s340_s16 = sshll.u32 %s418_s14, 4  ;;  %s341_s16 = int_to_ptr.vmem [resolvable:$false] %s340_s16 }
  0x22   : > { %s342_s20 = scalar_lea.vmem %s341_s16, 256  ;;  %p343_p11 = scmp.lt.s32.totalorder %s501_s27, %s341_s16 }
  0x23   : > { %p338_p4 = pnand %p336_p2, %p322_p3  ;;  %p344_p5 = scmp.lt.s32.totalorder %s342_s20, %s335_s13 }
  0x25   : > { %p339_p12 = pneg %p338_p4  ;;  %p345_p8 = por %p344_p5, %p343_p11 }
  0x27   : > { %p346_p9 = pnand %p345_p8, %p339_p12 }
  0x29   : > { %349 = shalt.err (!%p346_p9)
}
  0x2a   : > { %279 = dma.hbm_to_vmem [thread:$0]  (!%p497_p13), %s493_s25, 128, %s501_s27, %s88_s29  }
  0x2b   : > { %p603_p0 = scmp.lt.s32.totalorder %s416_s9, 3  ;;  %p604_p1 = scmp.ge.s32.totalorder %s416_s9, 1 }
  0x2d   : > { %p104_p3 = pnand %p604_p1, %p603_p0 }
  0x2e   : > { %s535_s21 = sand.u32 (!%p104_p3), 1, %s408_s7  }
  0x2f   : > { %107 = sbr.rel (%p104_p3) target bundleno = 252 (0xfc), region = 24  ;;  %s266_s22 = sshll.u32 (!%p104_p3), %s535_s21, 3 }
  0x30   : > { %s110_s23 = scalar_lea.sflag (!%p104_p3), [#allocation3], %s535_s21  ;;  %s113_s24 = scalar_lea.vmem (!%p104_p3), [#allocation2], %s266_s22 }
  0x36   : > { %395 = dma.done.wait (%p473_p6), %s110_s23, 128  }
  0x37   : > { %397 = vsyncadd (%p473_p6), %s110_s23, 4294967168  ;;  %v132_v0 = vld [vmem:[%s113_s24] sm:$0xff]  ;;  %s269_s17 = sshll.u32 %s451_s10, 7  ;;  %s131_s25 = scalar_lea.vmem [#allocation5], %s266_s22 }
  0x38   : > { %133 = vmax.xlane.f32.xlu0 %v132_v0  ;;  %s190_s26 = sshll.u32 %s131_s25, 4  ;;  %s551_s29 = scalar_lea.hbm %s596_s1, %s269_s17  ;;  %s553_s26 = int_to_ptr.vmem [resolvable:$true] %s190_s26 }
  0x39   : > { %s177_s30 = scalar_lea.sflag [#allocation4], %s535_s21  ;;  %s350_s10 = scalar_lea.vmem %s553_s26, 128 }
  0x3a   : > { %p351_p6 = scmp.ne.s32.totalorder %s553_s26, %s350_s10  ;;  %p605_p11 = scmp.ne.s32.totalorder %s600_s18, 0 }
  0x3b   : > { %s419_s2 = smov [#allocation5]  }
  0x3c   : > { %135 = vmin.xlane.f32.xlu0 %v132_v0  ;;  %p352_p12 = pnand %p351_p6, %p605_p11  ;;  %s354_s3 = sshll.u32 %s419_s2, 4  ;;  %s355_s3 = int_to_ptr.vmem [resolvable:$false] %s354_s3 }
  0x3d   : > { %s356_s4 = scalar_lea.vmem %s355_s3, 256  ;;  %p357_p7 = scmp.lt.s32.totalorder %s553_s26, %s355_s3 }
  0x3e   : > { %p353_p13 = pneg %p352_p12  ;;  %p358_p10 = scmp.lt.s32.totalorder %s356_s4, %s350_s10 }
  0x40   : > { %p359_p2 = por %p358_p10, %p357_p7 }
  0x42   : > { %p360_p4 = pnand %p359_p2, %p353_p13 }
  0xc5   : > { %v134_v1 = vpop.xlane.xlu0 %133 }
  0xc6   : > { %v137_v3 = vand.u32 2147483647, %v134_v1 }
  0xc9   : > { %v136_v2 = vpop.xlane.xlu0 %135 }
  0xca   : > { %v138_v4 = vand.u32 2147483647, %v136_v2 }
  0xcc   : > { %v139_v5 = vmax.f32.f32 %v137_v3, %v138_v4 }
  0xce   : > { %318 = vrcp.f32 %v139_v5 }
  0xd8   : > { %v319_v6 = vpop.eup %318 }
  0xd9   : > { %v141_v7 = vmul.f32 %v319_v6, %v132_v0 }
  0xdb   : > { %vm142_vm0 = vcmp.lt.f32.partialorder %v141_v7, -0.8480964  ;;  %vm144_vm1 = vcmp.ge.f32.partialorder %v141_v7, -0.8480964  ;;  %vm146_vm2 = vcmp.ge.f32.partialorder %v141_v7, -0.6106329 }
  0xdc   : > { %v143_v8 = vsel %vm142_vm0, -1.0, %v141_v7  ;;  %vm148_vm3 = vcmp.ge.f32.partialorder %v141_v7, -0.45999527  ;;  %vm150_vm4 = vcmp.ge.f32.partialorder %v141_v7, -0.33967942 }
  0xdd   : > { %v145_v9 = vsel %vm144_vm1, -0.6961928, %v143_v8  ;;  %vm152_vm5 = vcmp.ge.f32.partialorder %v141_v7, -0.2346074  ;;  %vm154_vm6 = vcmp.ge.f32.partialorder %v141_v7, -0.13791174 }
  0xde   : > { %v147_v10 = vsel %vm146_vm2, -0.52507305, %v145_v9  ;;  %vm156_vm7 = vcmp.ge.f32.partialorder %v141_v7, -0.045525018  ;;  %vm158_vm8 = vcmp.ge.f32.partialorder %v141_v7, 0.03979015 }
  0xdf   : > { %v149_v11 = vsel %vm148_vm3, -0.3949175, %v147_v10  ;;  %vm160_vm9 = vcmp.ge.f32.partialorder %v141_v7, 0.12025525  ;;  %vm162_vm10 = vcmp.ge.f32.partialorder %v141_v7, 0.20352125 }
  0xe0   : > { %v151_v12 = vsel %vm150_vm4, -0.28444138, %v149_v11  ;;  %vm164_vm11 = vcmp.ge.f32.partialorder %v141_v7, 0.29201376  ;;  %vm166_vm12 = vcmp.ge.f32.partialorder %v141_v7, 0.38931254 }
  0xe1   : > { %v153_v13 = vsel %vm152_vm5, -0.18477343, %v151_v12  ;;  %vm168_vm13 = vcmp.ge.f32.partialorder %v141_v7, 0.50166345  ;;  %vm170_vm14 = vcmp.ge.f32.partialorder %v141_v7, 0.6427869 }
  0xe2   : > { %v155_v14 = vsel %vm154_vm6, -0.091050036, %v153_v13  ;;  %vm172_vm15 = vcmp.ge.f32.partialorder %v141_v7, 0.86147845 }
  0xe3   : > { %v157_v15 = vsel %vm156_vm7, 0.0, %v155_v14 }
  0xe4   : > { %v159_v16 = vsel %vm158_vm8, 0.0795803, %v157_v15 }
  0xe5   : > { %v161_v17 = vsel %vm160_vm9, 0.1609302, %v159_v16 }
  0xe6   : > { %v163_v18 = vsel %vm162_vm10, 0.2461123, %v161_v17 }
  0xe7   : > { %v165_v19 = vsel %vm164_vm11, 0.33791524, %v163_v18 }
  0xe8   : > { %v167_v20 = vsel %vm166_vm12, 0.44070983, %v165_v19 }
  0xe9   : > { %v169_v21 = vsel %vm168_vm13, 0.562617, %v167_v20 }
  0xea   : > { %v171_v22 = vsel %vm170_vm14, 0.72295684, %v169_v21 }
  0xeb   : > { %v173_v23 = vsel %vm172_vm15, 1.0, %v171_v22 }
  0xec   : > { %v174_v24 = vmul.f32 %v173_v23, %v139_v5 }
  0xee   : > { %175 = vst [vmem:[%s131_s25] sm:$0xff] %v174_v24 }
  0xef   : > { %363 = shalt.err (!%p360_p4)
}
  0xf0   : > { %s364_s5 = scalar_lea.hbm %s551_s29, 128  ;;  %s368_s14 = scalar_lea.hbm %s596_s1, 256 }
  0xf1   : > { %p365_p5 = scmp.ne.s32.totalorder %s551_s29, %s364_s5  ;;  %p369_p0 = scmp.lt.u32.totalorder %s551_s29, %s596_s1 }
  0xf2   : > { %p370_p1 = scmp.lt.u32.totalorder %s368_s14, %s364_s5  ;;  %p372_p6 = scmp.lt.u32.totalorder %s364_s5, %s551_s29 }
  0xf3   : > { %p366_p8 = pnand %p365_p5, %p605_p11 }
  0xf4   : > { %p371_p3 = por %p370_p1, %p369_p0 }
  0xf5   : > { %p367_p9 = pneg %p366_p8 }
  0xf6   : > { %p373_p12 = por %p372_p6, %p371_p3 }
  0xf8   : > { %p374_p13 = pnand %p373_p12, %p367_p9 }
  0xfa   : > { %377 = shalt.err (!%p374_p13)
}
  0xfb   : > { %274 = dma.vmem_to_hbm [thread:$0]  (%p605_p11), %s553_s26, 128, %s551_s29, %s177_s30  }
  0xfc PF: > { %s202_s21 = sand.u32 1, %s404_s6   ;;  %p606_p7 = scmp.ne.s32.totalorder %s601_s19, 0 }
  0xfd   : > { %p607_p10 = scmp.ge.s32.totalorder %s416_s9, 2  ;;  %s203_s22 = scalar_lea.sflag [#allocation4], %s202_s21 }
  0xff   : > { %p281_p2 = pnand %p607_p10, %p606_p7 }
 0x101   : > { %399 = dma.done.wait (!%p281_p2), %s203_s22, 128  }
 0x102   : > { %401 = vsyncadd (!%p281_p2), %s203_s22, 4294967168  ;;  %p14_p4 = scmp.ge.s32.totalorder %s455_s12, 4   ;;  %s608_s6 = smov %s408_s7 }
 0x103   : > { %s609_s7 = smov %s412_s8  ;;  %s610_s8 = smov %s467_s15 }
 0x104   : > { %s611_s9 = smov %s455_s12  ;;  %16 = sbr.rel (!%p14_p4) target bundleno = 5 (0x5), region = 69 }
 0x10b   :  { %208 = vsyncpa [#allocation3], 1 }
 0x10c   :  { %210 = vsyncpa [#allocation3 + $0x1], 1 }
 0x10d   :  { %211 = vsyncpa [#allocation4], 1 }
 0x10e   :  { %213 = vsyncpa [#allocation4 + $0x1], 1 }

</bundles_post_ra>
